<compile_context>
chip_gen: v6e
topology: v6e:2x2x1
jax: 0.10.0
libtpu: 0.0.40
codegen_flags: <defaults>
</compile_context>

<pallas_src>
import functools
import numpy as np
import jax
import jax.numpy as jnp
from jax.experimental import pallas as pl
from jax.experimental.pallas import tpu as pltpu


# ---------------------------------------------------------------------------
# Fused kernel: init (layer 0) + one BasicBlock per grid step.
#   kernel args: inputs..., outputs..., scratch...
# ---------------------------------------------------------------------------
def _ista_fused_kernel(phix_ref, phi_ref, phit_ref, qinit_t_ref,
                       wt_t_ref, wi_t_ref,          # inputs (VMEM resident)
                       out_ref,                      # output slab [B, 2N]
                       ptp_ref, ptb_ref, x_ref,      # VMEM scratch (carried)
                       *, lambda_step, soft_thr, batch):
    layer = pl.program_id(0)

    # --- ISTA preamble, computed once into VMEM scratch ---------------------
    @pl.when(layer == 0)
    def _init():
        phi = phi_ref[...]
        phix = phix_ref[...]
        ptp_ref[...] = jnp.dot(phit_ref[...], phi,
                               preferred_element_type=jnp.float32)      # Phi^T Phi
        ptb_ref[...] = jnp.dot(phix, phi,
                               preferred_element_type=jnp.float32)      # Phix Phi
        x_ref[...] = jnp.dot(phix, qinit_t_ref[...],
                             preferred_element_type=jnp.float32)        # x0

    lam = jnp.float32(lambda_step)
    thr = jnp.float32(soft_thr)

    # --- BasicBlock ---------------------------------------------------------
    x = x_ref[...]
    # gradient step: x = x - lam * x@PhiTPhi + lam * PhiTb
    x = x - lam * jnp.dot(x, ptp_ref[...], preferred_element_type=jnp.float32)
    x = x + lam * ptb_ref[...]
    x_input = x

    # forward transform: F.linear(x, W_t) = x @ W_t^T  (wt_t_ref holds W_t^T)
    x_forward = jnp.dot(x_input, wt_t_ref[...],
                        preferred_element_type=jnp.float32)

    # soft threshold: sign(v)*relu(|v|-thr)  ==  v - clip(v, -thr, thr)
    x_soft = x_forward - jnp.clip(x_forward, -thr, thr)

    # backward transforms share the same RHS (W_i^T): do them as one matmul.
    lhs = jnp.concatenate([x_soft, x_forward], axis=0)               # [2B, D]
    back = jnp.dot(lhs, wi_t_ref[...],
                   preferred_element_type=jnp.float32)               # [2B, N]
    x_pred = back[:batch]
    sym = back[batch:] - x_input                                     # symloss

    # carry x to the next layer; emit lane-dense [B, 2N] slab [x_pred | sym]
    x_ref[...] = x_pred
    out_ref[...] = jnp.concatenate([x_pred, sym], axis=1)


# ---------------------------------------------------------------------------
# Wrapper: one fused pallas_call over the layer grid.
# ---------------------------------------------------------------------------
def ista_net_forward(phix, phi, qinit, wt_t, wi_t,
                     lambda_step, soft_thr, layer_no):
    B, M = phix.shape
    _, N = phi.shape
    D = wt_t.shape[1]

    # one-time, wrapper-side transposes (constants / inputs; no in-kernel .T)
    phi_t = phi.T                # [N, M]
    qinit_t = qinit.T            # [M, N]

    kernel = functools.partial(_ista_fused_kernel,
                               lambda_step=float(lambda_step),
                               soft_thr=float(soft_thr),
                               batch=B)

    in_specs = [
        pl.BlockSpec((B, M), lambda l: (0, 0)),   # Phix      (VMEM resident)
        pl.BlockSpec((M, N), lambda l: (0, 0)),   # Phi
        pl.BlockSpec((N, M), lambda l: (0, 0)),   # Phi^T
        pl.BlockSpec((M, N), lambda l: (0, 0)),   # Qinit^T
        pl.BlockSpec((N, D), lambda l: (0, 0)),   # W_t^T
        pl.BlockSpec((D, N), lambda l: (0, 0)),   # W_i^T
    ]
    # per-layer lane-dense slab [x_pred | sym], blocked by layer index
    out_spec = pl.BlockSpec((None, B, 2 * N), lambda l: (l, 0, 0))

    slab = pl.pallas_call(
        kernel,
        out_shape=jax.ShapeDtypeStruct((layer_no, B, 2 * N), jnp.float32),
        grid_spec=pltpu.PrefetchScalarGridSpec(
            num_scalar_prefetch=0,
            grid=(layer_no,),
            in_specs=in_specs,
            out_specs=out_spec,
            scratch_shapes=[
                pltpu.VMEM((N, N), jnp.float32),   # PhiTPhi
                pltpu.VMEM((B, N), jnp.float32),   # PhiTb
                pltpu.VMEM((B, N), jnp.float32),   # carried x
            ]),
        compiler_params=pltpu.CompilerParams(
            dimension_semantics=("arbitrary",)),   # x is carried across layers
    )(phix, phi, phi_t, qinit_t, wt_t, wi_t)

    x_final = slab[layer_no - 1, :, :N]
    layers_sym = [slab[i, :, N:] for i in range(layer_no)]
    return x_final, layers_sym


class ISTANet:
    """JAX/Pallas re-implementation of the PyTorch ISTANet forward pass."""

    def __init__(self, layer_no, signal_dim, dict_size):
        self.layer_no = layer_no
        # Deterministic parameter init (mirrors the '_DCT' branch):
        #   Dictionary [N, D] is a DCT-II style overcomplete dictionary.
        #   transform_matrix         = Dictionary^T  -> [D, N]
        #   inverse_transform_matrix = Dictionary    -> [N, D]
        n = np.arange(signal_dim)[:, None].astype(np.float64)
        k = np.arange(dict_size)[None, :].astype(np.float64)
        dictionary = np.cos(np.pi * (n + 0.5) * k / dict_size)
        dictionary *= np.sqrt(2.0 / dict_size)
        dictionary[:, 0] *= np.sqrt(0.5)
        self.dictionary = jnp.asarray(dictionary, jnp.float32)        # [N, D]
        self.transform_matrix = self.dictionary.T                      # [D, N]
        self.inverse_transform_matrix = self.dictionary                # [N, D]
        # pre-transposed weights consumed by the kernel (done once):
        self._wt_t = self.dictionary                                   # W_t^T [N, D]
        self._wi_t = self.dictionary.T                                 # W_i^T [D, N]
        self.lambda_step = 0.5
        self.soft_thr = 0.01

    @functools.partial(jax.jit, static_argnums=0)
    def __call__(self, phix, phi, qinit):
        return ista_net_forward(phix, phi, qinit, self._wt_t, self._wi_t,
                                self.lambda_step, self.soft_thr, self.layer_no)


# ---------------------------------------------------------------------------
# Pure-JAX reference for a sanity check
# ---------------------------------------------------------------------------
def _reference_forward(net, phix, phi, qinit):
    phitphi = phi.T @ phi
    phitb = phix @ phi
    x = phix @ qinit.T
    syms = []
    for _ in range(net.layer_no):
        x = x - net.lambda_step * (x @ phitphi)
        x = x + net.lambda_step * phitb
        x_input = x
        x_fwd = x_input @ net.transform_matrix.T
        x_soft = jnp.sign(x_fwd) * jnp.maximum(jnp.abs(x_fwd) - net.soft_thr, 0.0)
        x = x_soft @ net.inverse_transform_matrix.T
        x_est = x_fwd @ net.inverse_transform_matrix.T
        syms.append(x_est - x_input)
    return x, syms


if __name__ == "__main__":
    # Small, TPU-friendly shapes (4096 -> 64 signal dim, dictionary_size -> 128)
    B, M, N, D = 8, 16, 64, 128
    LAYER_NO = 3

    key = jax.random.PRNGKey(0)
    k1, k2, k3 = jax.random.split(key, 3)
    phi = jax.random.normal(k1, (M, N), jnp.float32) / np.sqrt(N)
    batch_x = jax.random.normal(k2, (B, N), jnp.float32)
    phix = batch_x @ phi.T                                   # [B, M]
    qinit = jax.random.normal(k3, (N, M), jnp.float32) / np.sqrt(M)

    net = ISTANet(LAYER_NO, signal_dim=N, dict_size=D)
    x_final, layers_sym = net(phix, phi, qinit)
    jax.block_until_ready(x_final)
    jax.block_until_ready(layers_sym)

    # correctness check vs pure-JAX reference
    x_ref, syms_ref = _reference_forward(net, phix, phi, qinit)
    np.testing.assert_allclose(np.asarray(x_final), np.asarray(x_ref),
                               rtol=1e-4, atol=1e-4)
    for a, b in zip(layers_sym, syms_ref):
        np.testing.assert_allclose(np.asarray(a), np.asarray(b),
                                   rtol=1e-4, atol=1e-4)

    print("KERNEL_OK")
</pallas_src>

<mosaic_0001>
module attributes {stable_mosaic.version = 11 : i64} {
  func.func @_ista_fused_kernel(%arg0: i32, %arg1: memref<8x16xf32, #tpu.memory_space<vmem>>, %arg2: memref<16x64xf32, #tpu.memory_space<vmem>>, %arg3: memref<64x16xf32, #tpu.memory_space<vmem>>, %arg4: memref<16x64xf32, #tpu.memory_space<vmem>>, %arg5: memref<64x128xf32, #tpu.memory_space<vmem>>, %arg6: memref<128x64xf32, #tpu.memory_space<vmem>>, %arg7: memref<1x8x128xf32, #tpu.memory_space<vmem>>, %arg8: memref<64x64xf32, #tpu.memory_space<vmem>>, %arg9: memref<8x64xf32, #tpu.memory_space<vmem>>, %arg10: memref<8x64xf32, #tpu.memory_space<vmem>>) attributes {dimension_semantics = [#tpu.dimension_semantics<arbitrary>], iteration_bounds = array<i64: 3>, scalar_prefetch = 0 : i64, scratch_operands = 3 : i64, tpu.core_type = #tpu.core_type<tc>, window_params = [{pipeline_mode = #tpu.pipeline_mode<synchronous>, transform_indices = @transform_0, window_bounds = array<i64: 8, 16>}, {pipeline_mode = #tpu.pipeline_mode<synchronous>, transform_indices = @transform_1, window_bounds = array<i64: 16, 64>}, {pipeline_mode = #tpu.pipeline_mode<synchronous>, transform_indices = @transform_2, window_bounds = array<i64: 64, 16>}, {pipeline_mode = #tpu.pipeline_mode<synchronous>, transform_indices = @transform_3, window_bounds = array<i64: 16, 64>}, {pipeline_mode = #tpu.pipeline_mode<synchronous>, transform_indices = @transform_4, window_bounds = array<i64: 64, 128>}, {pipeline_mode = #tpu.pipeline_mode<synchronous>, transform_indices = @transform_5, window_bounds = array<i64: 128, 64>}, {transform_indices = @transform_6, window_bounds = array<i64: 1, 8, 128>}]} {
    %c0_i32 = arith.constant 0 : i32
    %0 = arith.cmpi eq, %arg0, %c0_i32 : i32
    %1 = arith.extui %0 : i1 to i32
    %c0_i32_0 = arith.constant 0 : i32
    %2 = arith.cmpi ne, %1, %c0_i32_0 : i32
    scf.if %2 {
      %c0_22 = arith.constant 0 : index
      %c0_23 = arith.constant 0 : index
      %32 = vector.load %arg2[%c0_22, %c0_23] : memref<16x64xf32, #tpu.memory_space<vmem>>, vector<16x64xf32>
      %c0_24 = arith.constant 0 : index
      %c0_25 = arith.constant 0 : index
      %33 = vector.load %arg1[%c0_24, %c0_25] : memref<8x16xf32, #tpu.memory_space<vmem>>, vector<8x16xf32>
      %c0_26 = arith.constant 0 : index
      %c0_27 = arith.constant 0 : index
      %34 = vector.load %arg3[%c0_26, %c0_27] : memref<64x16xf32, #tpu.memory_space<vmem>>, vector<64x16xf32>
      %cst_28 = arith.constant dense<0.000000e+00> : vector<64x64xf32>
      %35 = tpu.matmul %34, %32, %cst_28 {dimension_numbers = #tpu.dot_dimension_numbers<[1], [0], [0], [1], [0, 0, 1, 1], [], []>} : vector<64x16xf32>, vector<16x64xf32>, vector<64x64xf32> -> vector<64x64xf32>
      %c0_29 = arith.constant 0 : index
      %c0_30 = arith.constant 0 : index
      %36 = vector.load %arg8[%c0_29, %c0_30] : memref<64x64xf32, #tpu.memory_space<vmem>>, vector<64x64xf32>
      tpu.vector_store %arg8[%c0_29, %c0_30], %35 {strides = array<i32>} : memref<64x64xf32, #tpu.memory_space<vmem>>, vector<64x64xf32>,
      %cst_31 = arith.constant dense<0.000000e+00> : vector<8x64xf32>
      %37 = tpu.matmul %33, %32, %cst_31 {dimension_numbers = #tpu.dot_dimension_numbers<[1], [0], [0], [1], [0, 0, 1, 1], [], []>} : vector<8x16xf32>, vector<16x64xf32>, vector<8x64xf32> -> vector<8x64xf32>
      %c0_32 = arith.constant 0 : index
      %c0_33 = arith.constant 0 : index
      %38 = vector.load %arg9[%c0_32, %c0_33] : memref<8x64xf32, #tpu.memory_space<vmem>>, vector<8x64xf32>
      tpu.vector_store %arg9[%c0_32, %c0_33], %37 {strides = array<i32>} : memref<8x64xf32, #tpu.memory_space<vmem>>, vector<8x64xf32>,
      %c0_34 = arith.constant 0 : index
      %c0_35 = arith.constant 0 : index
      %39 = vector.load %arg4[%c0_34, %c0_35] : memref<16x64xf32, #tpu.memory_space<vmem>>, vector<16x64xf32>
      %cst_36 = arith.constant dense<0.000000e+00> : vector<8x64xf32>
      %40 = tpu.matmul %33, %39, %cst_36 {dimension_numbers = #tpu.dot_dimension_numbers<[1], [0], [0], [1], [0, 0, 1, 1], [], []>} : vector<8x16xf32>, vector<16x64xf32>, vector<8x64xf32> -> vector<8x64xf32>
      %c0_37 = arith.constant 0 : index
      %c0_38 = arith.constant 0 : index
      %41 = vector.load %arg10[%c0_37, %c0_38] : memref<8x64xf32, #tpu.memory_space<vmem>>, vector<8x64xf32>
      tpu.vector_store %arg10[%c0_37, %c0_38], %40 {strides = array<i32>} : memref<8x64xf32, #tpu.memory_space<vmem>>, vector<8x64xf32>,
    } else {
    }
    %c0 = arith.constant 0 : index
    %c0_1 = arith.constant 0 : index
    %3 = vector.load %arg10[%c0, %c0_1] : memref<8x64xf32, #tpu.memory_space<vmem>>, vector<8x64xf32>
    %c0_2 = arith.constant 0 : index
    %c0_3 = arith.constant 0 : index
    %4 = vector.load %arg8[%c0_2, %c0_3] : memref<64x64xf32, #tpu.memory_space<vmem>>, vector<64x64xf32>
    %cst = arith.constant dense<0.000000e+00> : vector<8x64xf32>
    %5 = tpu.matmul %3, %4, %cst {dimension_numbers = #tpu.dot_dimension_numbers<[1], [0], [0], [1], [0, 0, 1, 1], [], []>} : vector<8x64xf32>, vector<64x64xf32>, vector<8x64xf32> -> vector<8x64xf32>
    %cst_4 = arith.constant 5.000000e-01 : f32
    %6 = vector.broadcast %cst_4 : f32 to vector<8x64xf32>
    %7 = arith.mulf %6, %5 : vector<8x64xf32>
    %8 = arith.subf %3, %7 : vector<8x64xf32>
    %c0_5 = arith.constant 0 : index
    %c0_6 = arith.constant 0 : index
    %9 = vector.load %arg9[%c0_5, %c0_6] : memref<8x64xf32, #tpu.memory_space<vmem>>, vector<8x64xf32>
    %cst_7 = arith.constant 5.000000e-01 : f32
    %10 = vector.broadcast %cst_7 : f32 to vector<8x64xf32>
    %11 = arith.mulf %10, %9 : vector<8x64xf32>
    %12 = arith.addf %8, %11 : vector<8x64xf32>
    %c0_8 = arith.constant 0 : index
    %c0_9 = arith.constant 0 : index
    %13 = vector.load %arg5[%c0_8, %c0_9] : memref<64x128xf32, #tpu.memory_space<vmem>>, vector<64x128xf32>
    %cst_10 = arith.constant dense<0.000000e+00> : vector<8x128xf32>
    %14 = tpu.matmul %12, %13, %cst_10 {dimension_numbers = #tpu.dot_dimension_numbers<[1], [0], [0], [1], [0, 0, 1, 1], [], []>} : vector<8x64xf32>, vector<64x128xf32>, vector<8x128xf32> -> vector<8x128xf32>
    %cst_11 = arith.constant 0.000000e+00 : f32
    %cst_12 = arith.constant 0.00999999977 : f32
    %15 = arith.subf %cst_11, %cst_12 : f32
    %cst_13 = arith.constant 0.00999999977 : f32
    %16 = vector.broadcast %15 : f32 to vector<8x128xf32>
    %17 = arith.maximumf %16, %14 : vector<8x128xf32>
    %18 = vector.broadcast %cst_13 : f32 to vector<8x128xf32>
    %19 = arith.minimumf %18, %17 : vector<8x128xf32>
    %20 = arith.subf %14, %19 : vector<8x128xf32>
    %21 = tpu.concatenate %20, %14 in 0 : vector<8x128xf32>, vector<8x128xf32> -> vector<16x128xf32>
    %c0_14 = arith.constant 0 : index
    %c0_15 = arith.constant 0 : index
    %22 = vector.load %arg6[%c0_14, %c0_15] : memref<128x64xf32, #tpu.memory_space<vmem>>, vector<128x64xf32>
    %cst_16 = arith.constant dense<0.000000e+00> : vector<16x64xf32>
    %23 = tpu.matmul %21, %22, %cst_16 {dimension_numbers = #tpu.dot_dimension_numbers<[1], [0], [0], [1], [0, 0, 1, 1], [], []>} : vector<16x128xf32>, vector<128x64xf32>, vector<16x64xf32> -> vector<16x64xf32>
    %24 = vector.extract_strided_slice %23 {offsets = [0, 0], sizes = [8, 64], strides = [1, 1]} : vector<16x64xf32> to vector<8x64xf32>
    %25 = vector.extract_strided_slice %23 {offsets = [8, 0], sizes = [8, 64], strides = [1, 1]} : vector<16x64xf32> to vector<8x64xf32>
    %26 = arith.subf %25, %12 : vector<8x64xf32>
    %c0_17 = arith.constant 0 : index
    %c0_18 = arith.constant 0 : index
    %27 = vector.load %arg10[%c0_17, %c0_18] : memref<8x64xf32, #tpu.memory_space<vmem>>, vector<8x64xf32>
    tpu.vector_store %arg10[%c0_17, %c0_18], %24 {strides = array<i32>} : memref<8x64xf32, #tpu.memory_space<vmem>>, vector<8x64xf32>,
    %28 = tpu.concatenate %24, %26 in 1 : vector<8x64xf32>, vector<8x64xf32> -> vector<8x128xf32>
    %c0_19 = arith.constant 0 : index
    %c0_20 = arith.constant 0 : index
    %c0_21 = arith.constant 0 : index
    %29 = vector.load %arg7[%c0_19, %c0_20, %c0_21] : memref<1x8x128xf32, #tpu.memory_space<vmem>>, vector<1x8x128xf32>
    %30 = vector.shape_cast %29 : vector<1x8x128xf32> to vector<8x128xf32>
    %31 = vector.shape_cast %28 : vector<8x128xf32> to vector<1x8x128xf32>
    tpu.vector_store %arg7[%c0_19, %c0_20, %c0_21], %31 {strides = array<i32>} : memref<1x8x128xf32, #tpu.memory_space<vmem>>, vector<1x8x128xf32>,
    return
  }
  func.func @transform_0(%arg0: i32) -> (i32, i32) {
    %c0_i32 = arith.constant 0 : i32
    %c0_i32_0 = arith.constant 0 : i32
    %c0_i32_1 = arith.constant 0 : i32
    return %c0_i32, %c0_i32_0 : i32, i32
  }
  func.func @transform_1(%arg0: i32) -> (i32, i32) {
    %c0_i32 = arith.constant 0 : i32
    %c0_i32_0 = arith.constant 0 : i32
    %c0_i32_1 = arith.constant 0 : i32
    return %c0_i32, %c0_i32_0 : i32, i32
  }
  func.func @transform_2(%arg0: i32) -> (i32, i32) {
    %c0_i32 = arith.constant 0 : i32
    %c0_i32_0 = arith.constant 0 : i32
    %c0_i32_1 = arith.constant 0 : i32
    return %c0_i32, %c0_i32_0 : i32, i32
  }
  func.func @transform_3(%arg0: i32) -> (i32, i32) {
    %c0_i32 = arith.constant 0 : i32
    %c0_i32_0 = arith.constant 0 : i32
    %c0_i32_1 = arith.constant 0 : i32
    return %c0_i32, %c0_i32_0 : i32, i32
  }
  func.func @transform_4(%arg0: i32) -> (i32, i32) {
    %c0_i32 = arith.constant 0 : i32
    %c0_i32_0 = arith.constant 0 : i32
    %c0_i32_1 = arith.constant 0 : i32
    return %c0_i32, %c0_i32_0 : i32, i32
  }
  func.func @transform_5(%arg0: i32) -> (i32, i32) {
    %c0_i32 = arith.constant 0 : i32
    %c0_i32_0 = arith.constant 0 : i32
    %c0_i32_1 = arith.constant 0 : i32
    return %c0_i32, %c0_i32_0 : i32, i32
  }
  func.func @transform_6(%arg0: i32) -> (i32, i32, i32) {
    %c0_i32 = arith.constant 0 : i32
    %c0_i32_0 = arith.constant 0 : i32
    %c0_i32_1 = arith.constant 0 : i32
    return %arg0, %c0_i32, %c0_i32_0 : i32, i32, i32
  }
}

</mosaic_0001>

<bundles_post_ra>
// kernel: a_call__.1
= control target key start
LH: loop header
LB: loop body
LE: loop exit
PB: predicated region body
PF: predicated region fallthrough
CT: control target
= control target key end

     0   :  { %11 = vsyncpa [#allocation6], 0  ;;  %s1379_s0 = inlined_call_operand.vmem [shape: f32[8,16], index: 0, kind: input, shape index: {}]   ;;  %s1380_s1 = inlined_call_operand.vmem [shape: f32[16,64], index: 1, kind: input, shape index: {}]   ;;  %s1381_s2 = inlined_call_operand.vmem [shape: f32[64,16], index: 2, kind: input, shape index: {}]   ;;  %s1382_s3 = inlined_call_operand.hbm [shape: f32[16,64], index: 3, kind: input, shape index: {}]   ;;  %s1383_s4 = inlined_call_operand.vmem [shape: f32[64,128], index: 4, kind: input, shape index: {}]   ;;  %s1384_s5 = inlined_call_operand.hbm [shape: f32[128,64], index: 5, kind: input, shape index: {}]   ;;  %s1385_s6 = inlined_call_operand.vmem [shape: f32[3,8,128], index: 6, kind: output, shape index: {}]  }
   0x1   :  { %12 = vsyncpa [#allocation8], 0  ;;  %s1227_s21 = smov 0  }
   0x2 LB: > { %s1233_s22 = sadd.s32 4294967295, %s1181_s21   ;;  %p897_p0 = scmp.ge.s32.totalorder %s1181_s21, 1  ;;  %s1181_s21 = sphi %s1227_s21, %s18_s21  }
   0x3   : > { %p175_p1 = scmp.lt.s32.totalorder %s1181_s21, 4  ;;  %s1183_s23 = smov [#allocation5]  }
   0x4   : > { %s196_s24 = sshll.u32 %s1183_s23, 4  ;;  %p1094_p4 = scmp.eq.s32.totalorder %s1233_s22, 0  ;;  %s197_s24 = int_to_ptr.vmem [resolvable:$true] %s196_s24 }
   0x5   : > { %p1238_p3 = pnand %p897_p0, %p175_p1  ;;  %s1184_s26 = smov [#allocation7]  }
   0x6   : > { %s212_s27 = sshll.u32 %s1184_s26, 4  ;;  %s1126_s29 = scalar_lea.vmem %s197_s24, 256  ;;  %s213_s27 = int_to_ptr.vmem [resolvable:$true] %s212_s27 }
   0x7   : > { %p1087_p5 = pneg %p1238_p3  ;;  %p1127_p8 = scmp.ne.s32.totalorder %s197_s24, %s1126_s29 }
   0x8   : > { %p1134_p11 = scmp.lt.s32.totalorder %s197_s24, %s197_s24  ;;  %p1135_p12 = scmp.lt.s32.totalorder %s1126_s29, %s1126_s29 }
   0x9   : > { %p1247_p6 = pnand %p1094_p4, %p1087_p5 }
   0xa   : > { %p1136_p13 = por %p1135_p12, %p1134_p11 }
   0xb   : > { %p1117_p7 = pneg %p1247_p6 }
   0xd   : > { %p1129_p9 = pnand %p1127_p8, %p1117_p7 }
   0xf   : > { %p1130_p10 = pneg %p1129_p9 }
  0x11   : > { %p1137_p0 = pnand %p1136_p13, %p1130_p10 }
  0x13   : > { %1140 = shalt.err (!%p1137_p0)
}
  0x14   : > { %s1185_s30 = smov 128   ;;  %s1186_s7 = smov 8  }
  0x15   : > { %1090 = dma.hbm_to_vmem [thread:$0]  (!%p1247_p6), %s1382_s3, 256, %s197_s24, [#allocation6], %s1185_s30, %s1185_s30, %s1186_s7  }
  0x16   : > { %s1152_s10 = scalar_lea.vmem %s213_s27, 2048  ;;  %p1160_p9 = scmp.lt.s32.totalorder %s213_s27, %s213_s27 }
  0x17   : > { %p1153_p1 = scmp.ne.s32.totalorder %s213_s27, %s1152_s10  ;;  %p1161_p2 = scmp.lt.s32.totalorder %s1152_s10, %s1152_s10 }
  0x19   : > { %p1155_p5 = pnand %p1153_p1, %p1117_p7  ;;  %p1162_p11 = por %p1161_p2, %p1160_p9 }
  0x1b   : > { %p1156_p8 = pneg %p1155_p5 }
  0x1d   : > { %p1163_p10 = pnand %p1162_p11, %p1156_p8 }
  0x1f   : > { %1166 = shalt.err (!%p1163_p10)
}
  0x20   : > { %1093 = dma.hbm_to_vmem [thread:$0]  (!%p1247_p6), %s1384_s5, 2048, %s213_s27, [#allocation8], %s1185_s30, %s1185_s30, %s1186_s7  }
  0x21   : > { %228 = sbr.rel (%p1238_p3) target bundleno = 985 (0x3d9), region = 44 }
  0x26   : > { %1172 = dma.done.wait (%p1094_p4), [#allocation6], 256  }
  0x27   : > { %1174 = vsyncadd (%p1094_p4), [#allocation6], 4294967040 }
  0x28   : > { %1176 = dma.done.wait (%p1094_p4), [#allocation8], 2048  }
  0x29   : > { %1178 = vsyncadd (%p1094_p4), [#allocation8], 4294965248  ;;  %p256_p2 = scmp.lt.s32.totalorder %s1233_s22, 2  ;;  %p1388_p3 = scmp.ne.s32.totalorder %s1233_s22, 0 }
  0x2b   : > { %s257_s13 = scalar_select %p256_p2, %s1233_s22, 2 }
  0x2c   : > { %263 = sbr.rel (%p1388_p3) target bundleno = 259 (0x103), region = 56 }
  0x2d   : > { %s903_s14 = sshll.u32 %s257_s13, 3 }
  0x2e   : > { %s1284_s17 = scalar_lea.vmem %s1385_s6, %s903_s14 }
  0x31   : > { %v265_v0 = vld [vmem:[%s1380_s1 + $0x8] sm:$0xff]  ;;  %v264_v1 = vld [vmem:[%s1380_s1] sm:$0xff]  ;;  %vm275_vm0 = vcmask 130048   ;;  %v273_v3 = vld [vmem:[%s1381_s2 + $0x30] sm:$0xff]  ;;  %v1187_v7 = vmov 0.0   ;;  %vm1188_vm1 = vmmov 0  }
  0x32   : > { %972 = vmatprep.subr.mxu0 %v265_v0  ;;  %1075 = vmatprep.subr.mxu1 %v265_v0  ;;  %v267_v2 = vld [vmem:[%s1381_s2] sm:$0xff]  ;;  %v268_v4 = vld [vmem:[%s1381_s2 + $0x8] sm:$0xff]  ;;  %v274_v5 = vld [vmem:[%s1381_s2 + $0x38] sm:$0xff]  ;;  %vm405_vm2 = vcmask 523264  }
  0x33   : > { %973 = vmatpush3.msra.mxu0 %v265_v0  ;;  %1077 = vmatpush3.msra.mxu1 %v265_v0  ;;  %v269_v6 = vld [vmem:[%s1381_s2 + $0x10] sm:$0xff]  ;;  %v270_v8 = vld [vmem:[%s1381_s2 + $0x18] sm:$0xff]  ;;  %v266_v9 = vld [vmem:[%s1379_s0] sm:$0xff] }
  0x34   : > { %974 = vmatprep.subr.mxu0 %v264_v1  ;;  %1076 = vmatprep.subr.mxu1 %v264_v1  ;;  %v489_v10 = vld [vmem:[#allocation5 + $0x8] sm:$0xff]  ;;  %v271_v11 = vld [vmem:[%s1381_s2 + $0x20] sm:$0xff]  ;;  %v488_v12 = vld [vmem:[#allocation5] sm:$0xff] }
  0x35   : > { %975 = vmatpush3.msra.mxu0 %v264_v1  ;;  %1078 = vmatpush3.msra.mxu1 %v264_v1  ;;  %v272_v13 = vld [vmem:[%s1381_s2 + $0x28] sm:$0xff] }
  0x36   : > { %976 = vmatprep.mubr.msk.f32.mxu0 %vm275_vm0, %v267_v2  ;;  %985 = vmatprep.mubr.msk.f32.mxu1 %vm275_vm0, %v273_v3 }
  0x37   : > { %977 = vmatmul.mubr.msk.f32.vlgmr.msra.gmra.mxu0 %vm275_vm0, %v268_v4  ;;  %986 = vmatmul.mubr.msk.f32.vlgmr.msra.gmra.mxu1 %vm275_vm0, %v274_v5 }
  0x38   : > { %988 = vmatprep.subr.mxu1 %v1187_v7  ;;  %979 = vmatprep.mubr.msk.f32.mxu0 %vm275_vm0, %v269_v6 }
  0x39   : > { %989 = vmatpush3.msra.mxu1 %v265_v0  ;;  %992 = vmatprep.mubr.msk.f32.mxu1 %vm1188_vm1, %v1187_v7 }
  0x3a   : > { %990 = vmatprep.subr.mxu1 %v1187_v7 }
  0x3b   : > { %991 = vmatpush3.msra.mxu1 %v264_v1  ;;  %980 = vmatmul.mubr.msk.f32.gmra.mxu0 %vm275_vm0, %v270_v8 }
  0x3c   : > { %993 = vmatmul.mubr.msk.f32.vlgmr.msra.gmra.mxu1 %vm275_vm0, %v266_v9  ;;  %995 = vmatprep.subr.mxu1 %v1187_v7 }
  0x3d   : > { %996 = vmatpush3.msra.mxu1 %v489_v10  ;;  %982 = vmatprep.mubr.msk.f32.mxu0 %vm275_vm0, %v271_v11 }
  0x3e   : > { %997 = vmatprep.subr.mxu1 %v1187_v7  ;;  %999 = vmatprep.mubr.msk.f32.mxu1 %vm1188_vm1, %v1187_v7 }
  0x3f   : > { %998 = vmatpush3.msra.mxu1 %v488_v12  ;;  %983 = vmatmul.mubr.msk.f32.gmra.mxu0 %vm275_vm0, %v272_v13 }
  0x40   : > { %1000 = vmatmul.mubr.msk.f32.vlgmr.msra.gmra.mxu1 %vm275_vm0, %v266_v9 }
  0xf7   : > { %v978_v14 = vpop.f32.mrf.mxu0  ;;  %v987_v15 = vpop.f32.mrf.mxu1 }
  0xf8   : > { %407 = vst.msk [vmem:[#allocation2 + $0x8] sm:$0xff] %vm405_vm2, %v978_v14  ;;  %413 = vst.msk [vmem:[#allocation2 + $0x38] sm:$0xff] %vm405_vm2, %v987_v15 }
  0xf9   : > { %v366_v16 = vpop.f32.mrf.mxu0  ;;  %v396_v17 = vpop.f32.mrf.mxu1 }
  0xfa   : > { %406 = vst.msk [vmem:[#allocation2] sm:$0xff] %vm405_vm2, %v366_v16  ;;  %412 = vst.msk [vmem:[#allocation2 + $0x30] sm:$0xff] %vm405_vm2, %v396_v17 }
  0xfb   : > { %v981_v18 = vpop.f32.mrf.mxu0 }
  0xfc   : > { %409 = vst.msk [vmem:[#allocation2 + $0x18] sm:$0xff] %vm405_vm2, %v981_v18  ;;  %v483_v19 = vpop.f32.mrf.mxu1 }
  0xfd   : > { %487 = vst.msk [vmem:[#allocation3] sm:$0xff] %vm405_vm2, %v483_v19  ;;  %v376_v20 = vpop.f32.mrf.mxu0 }
  0xfe   : > { %408 = vst.msk [vmem:[#allocation2 + $0x10] sm:$0xff] %vm405_vm2, %v376_v20  ;;  %v994_v21 = vpop.f32.mrf.mxu1 }
  0xff   : > { %v984_v22 = vpop.f32.mrf.mxu0 }
 0x100   : > { %411 = vst.msk [vmem:[#allocation2 + $0x28] sm:$0xff] %vm405_vm2, %v984_v22  ;;  %v556_v23 = vpop.f32.mrf.mxu1 }
 0x101   : > { %560 = vst.msk [vmem:[#allocation4] sm:$0xff] %vm405_vm2, %v556_v23  ;;  %v386_v24 = vpop.f32.mrf.mxu0 }
 0x102   : > { %410 = vst.msk [vmem:[#allocation2 + $0x20] sm:$0xff] %vm405_vm2, %v386_v24  ;;  %v1001_v25 = vpop.f32.mrf.mxu1 }
 0x103 PF: > { %v569_v26 = vld [vmem:[#allocation2 + $0x38] sm:$0xff]  ;;  %v1189_v27 = vmov 0.0   ;;  %v568_v28 = vld [vmem:[#allocation2 + $0x30] sm:$0xff]  ;;  %vm1190_vm3 = vmmov 0   ;;  %v563_v33 = vld [vmem:[#allocation2 + $0x8] sm:$0xff]  ;;  %vm570_vm4 = vcmask 523264  }
 0x104   : > { %1002 = vmatprep.subr.mxu1 %v1189_v27  ;;  %1018 = vmatprep.mubr.msk.f32.mxu1 %vm1190_vm3, %v1189_v27  ;;  %v565_v31 = vld [vmem:[#allocation2 + $0x18] sm:$0xff]  ;;  %v562_v34 = vld [vmem:[#allocation2] sm:$0xff]  ;;  %v655_v37 = vld [vmem:[%s1383_s4 + $0x30] sm:$0xff]  ;;  %s1191_s11 = smov 64  }
 0x105   : > { %1003 = vmatpush3.msra.mxu1 %v569_v26  ;;  %v564_v32 = vld [vmem:[#allocation2 + $0x10] sm:$0xff]  ;;  %v656_v36 = vld [vmem:[%s1383_s4 + $0x38] sm:$0xff]  ;;  %v654_v38 = vld [vmem:[%s1383_s4 + $0x28] sm:$0xff] }
 0x106   : > { %1004 = vmatprep.subr.mxu1 %v1189_v27  ;;  %v653_v39 = vld [vmem:[%s1383_s4 + $0x20] sm:$0xff]  ;;  %v652_v40 = vld [vmem:[%s1383_s4 + $0x18] sm:$0xff]  ;;  %v651_v41 = vld [vmem:[%s1383_s4 + $0x10] sm:$0xff] }
 0x107   : > { %v567_v29 = vld [vmem:[#allocation2 + $0x28] sm:$0xff]  ;;  %1005 = vmatpush3.msra.mxu1 %v568_v28  ;;  %v649_v43 = vld [vmem:[%s1383_s4] sm:$0xff]  ;;  %v748_v44 = vld [vmem:[#allocation7 + $0x78] sm:$0xff] }
 0x108   : > { %1006 = vmatprep.subr.mxu1 %v1189_v27  ;;  %v1342_v35 = vld [vmem:[#allocation4] sm:$0xff]  ;;  %v747_v45 = vld [vmem:[#allocation7 + $0x70] sm:$0xff]  ;;  %1040 = vmatprep.subr.mxu0 %v748_v44  ;;  %v745_v47 = vld [vmem:[#allocation7 + $0x60] sm:$0xff] }
 0x109   : > { %v566_v30 = vld [vmem:[#allocation2 + $0x20] sm:$0xff]  ;;  %1007 = vmatpush3.msra.mxu1 %v567_v29  ;;  %v650_v42 = vld [vmem:[%s1383_s4 + $0x8] sm:$0xff]  ;;  %1041 = vmatpush3.msra.mxu0 %v748_v44  ;;  %v744_v48 = vld [vmem:[#allocation7 + $0x58] sm:$0xff] }
 0x10a   : > { %1008 = vmatprep.subr.mxu1 %v1189_v27  ;;  %v746_v46 = vld [vmem:[#allocation7 + $0x68] sm:$0xff]  ;;  %1042 = vmatprep.subr.mxu0 %v747_v45  ;;  %v743_v49 = vld [vmem:[#allocation7 + $0x50] sm:$0xff]  ;;  %v741_v51 = vld [vmem:[#allocation7 + $0x40] sm:$0xff] }
 0x10b   : > { %1009 = vmatpush3.msra.mxu1 %v566_v30  ;;  %1043 = vmatpush3.msra.mxu0 %v747_v45  ;;  %v742_v50 = vld [vmem:[#allocation7 + $0x48] sm:$0xff]  ;;  %v740_v52 = vld [vmem:[#allocation7 + $0x38] sm:$0xff]  ;;  %v739_v53 = vld [vmem:[#allocation7 + $0x30] sm:$0xff] }
 0x10c   : > { %1010 = vmatprep.subr.mxu1 %v1189_v27  ;;  %1044 = vmatprep.subr.mxu0 %v746_v46  ;;  %v738_v54 = vld [vmem:[#allocation7 + $0x28] sm:$0xff]  ;;  %v737_v55 = vld [vmem:[#allocation7 + $0x20] sm:$0xff]  ;;  %v736_v56 = vld [vmem:[#allocation7 + $0x18] sm:$0xff] }
 0x10d   : > { %1011 = vmatpush3.msra.mxu1 %v565_v31  ;;  %1045 = vmatpush3.msra.mxu0 %v746_v46  ;;  %v646_v57 = vld [vmem:[#allocation3] sm:$0xff]  ;;  %v735_v0 = vld [vmem:[#allocation7 + $0x10] sm:$0xff]  ;;  %v734_v1 = vld [vmem:[#allocation7 + $0x8] sm:$0xff] }
 0x10e   : > { %1012 = vmatprep.subr.mxu1 %v1189_v27  ;;  %1046 = vmatprep.subr.mxu0 %v745_v47  ;;  %v647_v60 = vmul.f32 0.5, %v646_v57  ;;  %v733_v2 = vld [vmem:[#allocation7] sm:$0xff] }
 0x10f   : > { %1013 = vmatpush3.msra.mxu1 %v564_v32  ;;  %1047 = vmatpush3.msra.mxu0 %v745_v47 }
 0x110   : > { %1014 = vmatprep.subr.mxu1 %v1189_v27  ;;  %1048 = vmatprep.subr.mxu0 %v744_v48 }
 0x111   : > { %1015 = vmatpush3.msra.mxu1 %v563_v33  ;;  %1049 = vmatpush3.msra.mxu0 %v744_v48 }
 0x112   : > { %1016 = vmatprep.subr.mxu1 %v1189_v27  ;;  %1050 = vmatprep.subr.mxu0 %v743_v49 }
 0x113   : > { %1017 = vmatpush3.msra.mxu1 %v562_v34  ;;  %1051 = vmatpush3.msra.mxu0 %v743_v49 }
 0x114   : > { %1019 = vmatmul.mubr.msk.f32.vlgmr.msra.gmra.mxu1 %vm570_vm4, %v1342_v35  ;;  %1021 = vmatprep.subr.mxu1 %v1189_v27 }
 0x115   : > { %1022 = vmatpush3.msra.mxu1 %v656_v36  ;;  %1037 = vmatprep.mubr.msk.f32.mxu1 %vm1190_vm3, %v1189_v27 }
 0x116   : > { %1023 = vmatprep.subr.mxu1 %v1189_v27  ;;  %1052 = vmatprep.subr.mxu0 %v742_v50 }
 0x117   : > { %1024 = vmatpush3.msra.mxu1 %v655_v37  ;;  %1053 = vmatpush3.msra.mxu0 %v742_v50 }
 0x118   : > { %1025 = vmatprep.subr.mxu1 %v1189_v27  ;;  %1054 = vmatprep.subr.mxu0 %v741_v51 }
 0x119   : > { %1026 = vmatpush3.msra.mxu1 %v654_v38  ;;  %1055 = vmatpush3.msra.mxu0 %v741_v51 }
 0x11a   : > { %1027 = vmatprep.subr.mxu1 %v1189_v27  ;;  %1056 = vmatprep.subr.mxu0 %v740_v52 }
 0x11b   : > { %1028 = vmatpush3.msra.mxu1 %v653_v39  ;;  %1057 = vmatpush3.msra.mxu0 %v740_v52 }
 0x11c   : > { %1029 = vmatprep.subr.mxu1 %v1189_v27  ;;  %1058 = vmatprep.subr.mxu0 %v739_v53 }
 0x11d   : > { %1030 = vmatpush3.msra.mxu1 %v652_v40  ;;  %1059 = vmatpush3.msra.mxu0 %v739_v53 }
 0x11e   : > { %1031 = vmatprep.subr.mxu1 %v1189_v27  ;;  %1060 = vmatprep.subr.mxu0 %v738_v54 }
 0x11f   : > { %1032 = vmatpush3.msra.mxu1 %v651_v41  ;;  %1061 = vmatpush3.msra.mxu0 %v738_v54 }
 0x120   : > { %1033 = vmatprep.subr.mxu1 %v1189_v27  ;;  %1062 = vmatprep.subr.mxu0 %v737_v55 }
 0x121   : > { %1034 = vmatpush3.msra.mxu1 %v650_v42  ;;  %1063 = vmatpush3.msra.mxu0 %v737_v55 }
 0x122   : > { %1035 = vmatprep.subr.mxu1 %v1189_v27  ;;  %1064 = vmatprep.subr.mxu0 %v736_v56 }
 0x123   : > { %1036 = vmatpush3.msra.mxu1 %v649_v43  ;;  %1065 = vmatpush3.msra.mxu0 %v736_v56 }
 0x124   : > { %1066 = vmatprep.subr.mxu0 %v735_v0 }
 0x125   : > { %1067 = vmatpush3.msra.mxu0 %v735_v0 }
 0x126   : > { %1068 = vmatprep.subr.mxu0 %v734_v1 }
 0x127   : > { %1069 = vmatpush3.msra.mxu0 %v734_v1 }
 0x128   : > { %1070 = vmatprep.subr.mxu0 %v733_v2 }
 0x129   : > { %1071 = vmatpush3.msra.mxu0 %v733_v2 }
 0x1d4   : > { %v640_v58 = vpop.f32.mrf.mxu1 }
 0x1d5   : > { %v644_v59 = vmul.f32 0.5, %v640_v58 }
 0x1d6   : > { %v1020_v61 = vpop.f32.mrf.mxu1 }
 0x1d7   : > { %v645_v62 = vsub.f32 %v1342_v35, %v644_v59 }
 0x1d9   : > { %v648_v63 = vadd.f32 %v647_v60, %v645_v62 }
 0x1db   : > { %1038 = vmatmul.mubr.msk.f32.vlgmr.msra.gmra.mxu1 %vm570_vm4, %v648_v63 }
 0x29b   : > { %v726_v3 = vpop.f32.mrf.mxu1 }
 0x29c   : > { %v917_v4 = vclamps-f32 %v726_v3, 0.01 }
 0x29d   : > { %v1039_v5 = vpop.f32.mrf.mxu1 }
 0x29e   : > { %v732_v6 = vsub.f32 %v726_v3, %v917_v4 }
 0x2a0   : > { %1072 = vmatprep.mubr.f32.mxu0 %v732_v6 }
 0x2a1   : > { %1073 = vmatmul.mubr.f32.vlgmr.msra.gmra.mxu0 %v726_v3 }
 0x361   : > { %v1074_v7 = vpop.f32.mrf.mxu0 }
 0x362   : > { %v824_v8 = vsub.f32 %v1074_v7, %v648_v63 }
 0x363   : > { %v815_v9 = vpop.f32.mrf.mxu0 }
 0x364   : > { %825 = vst.msk [vmem:[#allocation4] sm:$0xff] %vm570_vm4, %v815_v9  ;;  %827 = vrot.lane.b32.xlu0 %v824_v8, %s1191_s11 }
 0x3d6   : > { %v828_v10 = vpop.permute.xlu0 %827 }
 0x3d7   : > { %v830_v11 = vsel %vm570_vm4, %v815_v9, %v828_v10 }
 0x3d8   : > { %831 = vst [vmem:[%s1284_s17] sm:$0xff] %v830_v11 }
 0x3d9 PF: > { %s18_s21 = sadd.s32 1, %s1181_s21  }
 0x3da   : > { %p15_p4 = scmp.ge.s32.totalorder %s18_s21, 5  }
 0x3dc   :  { %17 = sbr.rel (!%p15_p4) target bundleno = 2 (0x2), region = 84 }
 0x3e1   :  { %851 = vsyncpa [#allocation6], 1 }
 0x3e2   :  { %853 = vsyncpa [#allocation6 + $0x1], 1 }
 0x3e3   :  { %854 = vsyncpa [#allocation8], 1 }

</bundles_post_ra>
